<compile_context>
chip_gen: v5e
topology: v5e:2x2
jax: 0.10.0
libtpu: 0.0.40
codegen_flags: <defaults>
</compile_context>

<pallas_src>
import jax
import jax.numpy as jnp
from jax.experimental import pallas as pl
from jax.experimental.pallas import tpu as pltpu

EPS = 1e-5
NEG_SLOPE = 0.01  # nn.LeakyReLU() default


def _round_up(x, m):
    return (x + m - 1) // m * m


def _stats_kernel(x_ref, sx_ref, sxx_ref):
    """Stream tiles of x_flat (C1, T); accumulate sum(x) and Sxx = x x^T."""
    @pl.when(pl.program_id(0) == 0)
    def _():
        sx_ref[...] = jnp.zeros_like(sx_ref)
        sxx_ref[...] = jnp.zeros_like(sxx_ref)

    xt = x_ref[...]                                         # (C1, T) f32
    # Per-channel sums (single pass: sum + sum-of-products, no centered pass).
    sx_ref[...] += jnp.sum(xt, axis=1, keepdims=True)       # (C1, 1)
    # C1 x C1 second-moment matrix: xt @ xt^T (contract over the lane axis).
    sxx_ref[...] += pl.dot(xt, xt, trans_b=True)            # (C1, C1) f32 acc


def _conv_bn_act_kernel(x_ref, ws_ref, shift_ref, o_ref):
    """Lane-dense pointwise conv with BN scale folded into W, + shift, LeakyReLU."""
    z = jnp.dot(ws_ref[...], x_ref[...],
                preferred_element_type=jnp.float32)         # (C2, T)
    z = z + shift_ref[...]                                  # + (C2, 1) per-channel shift
    o_ref[...] = jnp.where(z >= 0, z, NEG_SLOPE * z).astype(o_ref.dtype)


def conv_bn_act(x, w, gamma, beta, *, tile_lanes=512):
    """x: (N, C1, L), w: (C2, C1), gamma/beta: (C2,). Returns (N, C2, L) float32."""
    n, c1, l = x.shape
    c2 = w.shape[0]
    nl = n * l

    x = x.astype(jnp.float32)
    w = w.astype(jnp.float32)
    gamma = gamma.astype(jnp.float32)
    beta = beta.astype(jnp.float32)

    # Lane-dense layout: (N, C1, L) -> (C1, N*L), zero-padded to a multiple of
    # the lane tile.  Zero columns contribute nothing to the stats sums and the
    # corresponding outputs are sliced off below.
    t = min(tile_lanes, _round_up(nl, 128))
    nl_pad = _round_up(nl, t)
    nt = nl_pad // t
    x_flat = jnp.transpose(x, (1, 0, 2)).reshape(c1, nl)
    if nl_pad != nl:
        x_flat = jnp.pad(x_flat, ((0, 0), (0, nl_pad - nl)))

    # ---- Pass 1: streamed accumulation of sum(x) and Sxx (tiny C1 x C1). ----
    sx, sxx = pl.pallas_call(
        _stats_kernel,
        out_shape=(jax.ShapeDtypeStruct((c1, 1), jnp.float32),
                   jax.ShapeDtypeStruct((c1, c1), jnp.float32)),
        grid=(nt,),
        in_specs=[pl.BlockSpec((c1, t), lambda j: (0, j))],
        out_specs=(pl.BlockSpec((c1, 1), lambda j: (0, 0)),
                   pl.BlockSpec((c1, c1), lambda j: (0, 0))),
        compiler_params=pltpu.CompilerParams(
            dimension_semantics=("arbitrary",)),   # accumulation axis
    )(x_flat)

    # ---- Analytic BN stats of the conv output (train mode, biased var). ----
    # O(C2*C1^2) scalar-scale math; folded into per-channel scale/shift.
    # (f32 accumulation; guard var >= 0 against E[y^2]-mean^2 cancellation.)
    mean_x = sx[:, 0] / nl                                   # (C1,)
    mean_y = w @ mean_x                                      # (C2,)
    ey2 = jnp.sum((w @ sxx) * w, axis=1) / nl                # diag(W Sxx W^T)/NL
    var = jnp.maximum(ey2 - mean_y * mean_y, 0.0)
    scale = gamma * jax.lax.rsqrt(var + EPS)                 # (C2,)
    shift = (beta - mean_y * scale).reshape(c2, 1)           # (C2, 1)
    w_scaled = scale[:, None] * w                            # BN scale folded into conv W

    # ---- Pass 2: streamed conv + shift + LeakyReLU, lane-dense output. ----
    y_flat = pl.pallas_call(
        _conv_bn_act_kernel,
        out_shape=jax.ShapeDtypeStruct((c2, nl_pad), jnp.float32),
        grid=(nt,),
        in_specs=[pl.BlockSpec((c1, t), lambda j: (0, j)),
                  pl.BlockSpec((c2, c1), lambda j: (0, 0)),
                  pl.BlockSpec((c2, 1), lambda j: (0, 0))],
        out_specs=pl.BlockSpec((c2, t), lambda j: (0, j)),
        compiler_params=pltpu.CompilerParams(
            dimension_semantics=("parallel",)),    # independent tiles (v7x 2 TCs)
    )(x_flat, w_scaled, shift)

    # Back to PyTorch NCL layout.
    return jnp.transpose(y_flat[:, :nl].reshape(c2, n, l), (1, 0, 2))


def reference(x, w, gamma, beta):
    """Pure-JAX reference mirroring PyTorch train-mode forward."""
    y = jnp.einsum("oc,ncl->nol", w, x)
    mean = jnp.mean(y, axis=(0, 2), keepdims=True)
    var = jnp.mean((y - mean) ** 2, axis=(0, 2), keepdims=True)
    y_hat = (y - mean) / jnp.sqrt(var + EPS)
    y_hat = y_hat * gamma.reshape(1, -1, 1) + beta.reshape(1, -1, 1)
    return jnp.where(y_hat >= 0, y_hat, NEG_SLOPE * y_hat)


if __name__ == "__main__":
    key = jax.random.PRNGKey(0)
    k_x, k_w, k_g, k_b = jax.random.split(key, 4)

    # Small shapes; L*N chosen so the tiled/padded streaming path is exercised
    # (N*L = 600 -> lane tile 512, 2 grid steps, 424 padded columns sliced off).
    N, C1, C2, L = 3, 4, 8, 200

    x = jax.random.normal(k_x, (N, C1, L), dtype=jnp.float32)

    # Conv1d weight (c2, c1, k=1) with the k axis squeezed; kaiming-uniform-like bound.
    bound = 1.0 / jnp.sqrt(jnp.float32(C1 * 1))
    w = jax.random.uniform(k_w, (C2, C1), dtype=jnp.float32, minval=-bound, maxval=bound)

    # BN affine params: PyTorch inits gamma=1, beta=0; perturb deterministically.
    gamma = 1.0 + 0.1 * jax.random.normal(k_g, (C2,), dtype=jnp.float32)
    beta = 0.1 * jax.random.normal(k_b, (C2,), dtype=jnp.float32)

    out = conv_bn_act(x, w, gamma, beta)
    out = jax.block_until_ready(out)

    ref = reference(x, w, gamma, beta)
    assert out.shape == (N, C2, L), out.shape
    assert jnp.allclose(out, ref, atol=1e-4, rtol=1e-4), float(jnp.max(jnp.abs(out - ref)))

    print("KERNEL_OK")
</pallas_src>

<mosaic_0001>
module attributes {stable_mosaic.version = 11 : i64} {
  func.func @_stats_kernel(%arg0: i32, %arg1: memref<4x512xf32, #tpu.memory_space<vmem>>, %arg2: memref<4x1xf32, #tpu.memory_space<vmem>>, %arg3: memref<4x4xf32, #tpu.memory_space<vmem>>) attributes {dimension_semantics = [#tpu.dimension_semantics<arbitrary>], iteration_bounds = array<i64: 2>, scalar_prefetch = 0 : i64, scratch_operands = 0 : i64, tpu.core_type = #tpu.core_type<tc>, window_params = [{transform_indices = @transform_0, window_bounds = array<i64: 4, 512>}, {pipeline_mode = #tpu.pipeline_mode<synchronous>, transform_indices = @transform_1, window_bounds = array<i64: 4, 1>}, {pipeline_mode = #tpu.pipeline_mode<synchronous>, transform_indices = @transform_2, window_bounds = array<i64: 4, 4>}]} {
    %c0_i32 = arith.constant 0 : i32
    %0 = arith.cmpi eq, %arg0, %c0_i32 : i32
    %1 = arith.extui %0 : i1 to i32
    %c0_i32_0 = arith.constant 0 : i32
    %2 = arith.cmpi ne, %1, %c0_i32_0 : i32
    scf.if %2 {
      %cst_11 = arith.constant 0.000000e+00 : f32
      %13 = vector.broadcast %cst_11 : f32 to vector<4x1xf32>
      %c0_12 = arith.constant 0 : index
      %c0_13 = arith.constant 0 : index
      %14 = vector.load %arg2[%c0_12, %c0_13] : memref<4x1xf32, #tpu.memory_space<vmem>>, vector<4x1xf32>
      tpu.vector_store %arg2[%c0_12, %c0_13], %13 {strides = array<i32>} : memref<4x1xf32, #tpu.memory_space<vmem>>, vector<4x1xf32>,
      %cst_14 = arith.constant 0.000000e+00 : f32
      %15 = vector.broadcast %cst_14 : f32 to vector<4x4xf32>
      %c0_15 = arith.constant 0 : index
      %c0_16 = arith.constant 0 : index
      %16 = vector.load %arg3[%c0_15, %c0_16] : memref<4x4xf32, #tpu.memory_space<vmem>>, vector<4x4xf32>
      tpu.vector_store %arg3[%c0_15, %c0_16], %15 {strides = array<i32>} : memref<4x4xf32, #tpu.memory_space<vmem>>, vector<4x4xf32>,
    } else {
    }
    %c0 = arith.constant 0 : index
    %c0_1 = arith.constant 0 : index
    %3 = vector.load %arg1[%c0, %c0_1] : memref<4x512xf32, #tpu.memory_space<vmem>>, vector<4x512xf32>
    %c0_2 = arith.constant 0 : index
    %c0_3 = arith.constant 0 : index
    %4 = vector.load %arg2[%c0_2, %c0_3] : memref<4x1xf32, #tpu.memory_space<vmem>>, vector<4x1xf32>
    %cst = arith.constant dense<0.000000e+00> : vector<4xf32>
    %5 = vector.multi_reduction <add>, %3, %cst [1] : vector<4x512xf32> to vector<4xf32>
    %6 = vector.shape_cast %5 : vector<4xf32> to vector<4x1xf32>
    %7 = arith.addf %4, %6 : vector<4x1xf32>
    %c0_4 = arith.constant 0 : index
    %c0_5 = arith.constant 0 : index
    %8 = vector.load %arg2[%c0_4, %c0_5] : memref<4x1xf32, #tpu.memory_space<vmem>>, vector<4x1xf32>
    tpu.vector_store %arg2[%c0_4, %c0_5], %7 {strides = array<i32>} : memref<4x1xf32, #tpu.memory_space<vmem>>, vector<4x1xf32>,
    %c0_6 = arith.constant 0 : index
    %c0_7 = arith.constant 0 : index
    %9 = vector.load %arg3[%c0_6, %c0_7] : memref<4x4xf32, #tpu.memory_space<vmem>>, vector<4x4xf32>
    %cst_8 = arith.constant dense<0.000000e+00> : vector<4x4xf32>
    %10 = tpu.matmul %3, %3, %cst_8 {dimension_numbers = #tpu.dot_dimension_numbers<[1], [1], [0], [0], [0, 0, 1, 0], [], []>} : vector<4x512xf32>, vector<4x512xf32>, vector<4x4xf32> -> vector<4x4xf32>
    %11 = arith.addf %9, %10 : vector<4x4xf32>
    %c0_9 = arith.constant 0 : index
    %c0_10 = arith.constant 0 : index
    %12 = vector.load %arg3[%c0_9, %c0_10] : memref<4x4xf32, #tpu.memory_space<vmem>>, vector<4x4xf32>
    tpu.vector_store %arg3[%c0_9, %c0_10], %11 {strides = array<i32>} : memref<4x4xf32, #tpu.memory_space<vmem>>, vector<4x4xf32>,
    return
  }
  func.func @transform_0(%arg0: i32) -> (i32, i32) {
    %c0_i32 = arith.constant 0 : i32
    %c0_i32_0 = arith.constant 0 : i32
    return %c0_i32, %arg0 : i32, i32
  }
  func.func @transform_1(%arg0: i32) -> (i32, i32) {
    %c0_i32 = arith.constant 0 : i32
    %c0_i32_0 = arith.constant 0 : i32
    %c0_i32_1 = arith.constant 0 : i32
    return %c0_i32, %c0_i32_0 : i32, i32
  }
  func.func @transform_2(%arg0: i32) -> (i32, i32) {
    %c0_i32 = arith.constant 0 : i32
    %c0_i32_0 = arith.constant 0 : i32
    %c0_i32_1 = arith.constant 0 : i32
    return %c0_i32, %c0_i32_0 : i32, i32
  }
}

</mosaic_0001>

<bundles_post_ra>
// kernel: tpu_custom_call.1
= control target key start
LH: loop header
LB: loop body
LE: loop exit
PB: predicated region body
PF: predicated region fallthrough
CT: control target
= control target key end

     0   :  { %8 = vsyncpa [#allocation3], 0  ;;  %s636_s0 = inlined_call_operand.hbm [shape: f32[4,1024], index: 0, kind: input, shape index: {}]   ;;  %s637_s1 = inlined_call_operand.vmem [shape: f32[4,1], index: 1, kind: output, shape index: {0}]   ;;  %s638_s2 = inlined_call_operand.hbm [shape: f32[4,4], index: 2, kind: output, shape index: {1}]  }
   0x1   :  { %10 = vsyncpa [#allocation3 + $0x1], 0 }
   0x2   :  { %11 = vsyncpa [#allocation4], 0  ;;  %s533_s9 = smov 0   ;;  %s535_s10 = smov 0  }
   0x3   :  { %s537_s11 = smov 0   ;;  %s539_s12 = smov 0  }
   0x4 LB: > { %s552_s13 = sadd.s32 4294967295, %s514_s12   ;;  %s555_s14 = sadd.s32 1, %s514_s12   ;;  %s514_s12 = sphi %s539_s12, %s645_s12   ;;  %s510_s11 = sphi %s537_s11, %s644_s11   ;;  %s506_s10 = sphi %s535_s10, %s643_s10   ;;  %s502_s9 = sphi %s533_s9, %s642_s9  }
   0x5   : > { %s21_s15 = ssub.s32 %s514_s12, %s555_s14  ;;  %s24_s16 = sadd.s32 1, %s510_s11 }
   0x6   : > { %p22_p0 = scmp.eq.s32.totalorder %s21_s15, 0  ;;  %p31_p1 = scmp.ne.s32.totalorder %s510_s11, %s506_s10 }
   0x7   : > { %p32_p2 = scmp.eq.s32.totalorder %s514_s12, 0  ;;  %p37_p3 = scmp.ne.s32.totalorder %s506_s10, %s502_s9 }
   0x8   : > { %s565_s17 = scalar_select %p22_p0, %s510_s11, %s24_s16  }
   0x9   : > { %p567_p4 = por %p32_p2, %p31_p1  ;;  %p38_p5 = scmp.eq.s32.totalorder %s552_s13, 0 }
   0xa   : > { %p381_p6 = scmp.lt.s32.totalorder %s514_s12, 2  ;;  %s103_s20 = sand.u32 1, %s510_s11  }
   0xb   : > { %p573_p7 = por %p38_p5, %p37_p3  ;;  %s360_s21 = sshll.u32 %s103_s20, 4 }
   0xc   : > { %s370_s22 = sshll.u32 %s514_s12, 4  ;;  %s107_s26 = scalar_lea.vmem [#allocation2], %s360_s21 }
   0xd   : > { %s112_s25 = scalar_lea.hbm %s636_s0, %s370_s22  ;;  %s116_s27 = sshll.u32 %s107_s26, 4  ;;  %s117_s27 = int_to_ptr.vmem [resolvable:$true] %s116_s27 }
   0xe   : > { %s114_s28 = sshll.u32 %s112_s25, 4  ;;  %p584_p8 = pnand %p381_p6, %p567_p4  ;;  %s115_s28 = int_to_ptr.hbm [resolvable:$true] %s114_s28 }
   0xf   : > { %p363_p9 = scmp.ge.s32.totalorder %s514_s12, 1  ;;  %p121_p10 = scmp.lt.s32.totalorder %s514_s12, 3 }
  0x10   : > { %s104_s30 = scalar_lea.sflag [#allocation3], %s103_s20  ;;  %s418_s3 = sshra.s32 %s115_s28, 4  ;;  %s419_s3 = int_to_ptr.hbm [resolvable:$true] %s418_s3 }
  0x11   : > { %s420_s4 = scalar_lea.hbm %s419_s3, 16  ;;  %p422_p12 = pneg %p584_p8 }
  0x12   : > { %p421_p11 = scmp.ne.s32.totalorder %s419_s3, %s420_s4  ;;  %s425_s7 = scalar_lea.hbm %s636_s0, 32 }
  0x13   : > { %p426_p1 = scmp.lt.s32.totalorder %s419_s3, %s636_s0  ;;  %p427_p2 = scmp.lt.s32.totalorder %s425_s7, %s420_s4 }
  0x14   : > { %p423_p13 = pnand %p422_p12, %p421_p11 }
  0x15   : > { %p428_p3 = por %p427_p2, %p426_p1 }
  0x16   : > { %p424_p0 = pneg %p423_p13 }
  0x18   : > { %p429_p4 = pnand %p428_p3, %p424_p0 }
  0x1a   : > { %432 = shalt.err (!%p429_p4)
}
  0x1b   : > { %380 = dma.hbm_to_vmem [thread:$0]  (!%p584_p8), %s115_s28, 256, %s117_s27, %s104_s30  }
  0x1c   : > { %p122_p5 = pnand %p363_p9, %p121_p10 }
  0x1d   : > { %s127_s15 = sand.u32 (!%p122_p5), 1, %s506_s10  }
  0x1e   : > { %125 = sbr.rel (%p122_p5) target bundleno = 216 (0xd8), region = 24  ;;  %s364_s16 = sshll.u32 (!%p122_p5), %s127_s15, 4 }
  0x1f   : > { %s128_s18 = scalar_lea.sflag (!%p122_p5), [#allocation3], %s127_s15  ;;  %s131_s20 = scalar_lea.vmem (!%p122_p5), [#allocation2], %s364_s16 }
  0x23   : > { %493 = dma.done.wait (%p573_p7), %s128_s18, 256  }
  0x24   : > { %495 = vsyncadd (%p573_p7), %s128_s18, 4294967040  ;;  %p365_p6 = scmp.ne.s32.totalorder %s552_s13, 0 }
  0x26   : > { %152 = sbr.rel (%p365_p6) target bundleno = 46 (0x2e), region = 32 }
  0x2b   : > { %vm153_vm0 = vcmask 3072   ;;  %vm155_vm1 = vcmask 27648   ;;  %v516_v0 = vmov 0.0  }
  0x2c   : > { %154 = vst.msk [vmem:[%s637_s1] sm:$0xf] %vm153_vm0, %v516_v0 }
  0x2d   : > { %156 = vst.msk [vmem:[#allocation5] sm:$0xf] %vm155_vm1, %v516_v0 }
  0x2e PF: > { %v158_v1 = vld [vmem:[%s131_s20 + $0x8] sm:$0xff]  ;;  %v157_v2 = vld [vmem:[%s131_s20] sm:$0xff]  ;;  %vm173_vm2 = vcmask 1043456   ;;  %vm184_vm3 = vcmask 3072   ;;  %s517_s25 = smov [#allocation5]   ;;  %s303_s29 = sshll.u32 %s638_s2, 4  ;;  %s304_s29 = int_to_ptr.hbm [resolvable:$true] %s303_s29 }
  0x2f   : > { %164 = vst [vmem:[#allocation1 + $0x10] ss:$2 sm:$0xff] %v158_v1  ;;  %s301_s26 = sshll.u32 %s517_s25, 4  ;;  %vm290_vm4 = vcmask 27648   ;;  %p382_p7 = scmp.eq.s32.totalorder %s552_s13, 1  ;;  %s302_s26 = int_to_ptr.vmem [resolvable:$true] %s301_s26 }
  0x30   : > { %162 = vst [vmem:[#allocation1] ss:$2 sm:$0xff] %v157_v2 }
  0x33   : > { %v159_v22 = vld [vmem:[%s637_s1] sm:$0xf] }
  0x34   : > { %v186_v31 = vld [vmem:[#allocation5] sm:$0xf] }
  0x36   : > { %v167_v3 = vld.sshfl [vmem:[#allocation1 + $0x10] sm:$0xff pattern:$0x75316420]  ;;  %v168_v4 = vld.sshfl [vmem:[#allocation1 + $0x18] sm:$0xff pattern:$0x75316420] }
  0x37   : > { %189 = vst [vmem:[#allocation1 + $0x10] ss:$2 sm:$0xff] %v158_v1  ;;  %v165_v5 = vld.sshfl [vmem:[#allocation1] sm:$0xff pattern:$0x75316420]  ;;  %v177_v9 = vsel %vm173_vm2, %v167_v3, 0.0 }
  0x38   : > { %v166_v6 = vld.sshfl [vmem:[#allocation1 + $0x8] sm:$0xff pattern:$0x75316420]  ;;  %v174_v7 = vsel %vm173_vm2, %v165_v5, 0.0  ;;  %v179_v11 = vsel %vm173_vm2, %v168_v4, 0.0 }
  0x39   : > { %187 = vst [vmem:[#allocation1] ss:$2 sm:$0xff] %v157_v2  ;;  %v175_v8 = vsel %vm173_vm2, %v166_v6, 0.0 }
  0x3a   : > { %v176_v10 = vadd.f32 %v175_v8, %v174_v7 }
  0x3c   : > { %v178_v12 = vadd.f32 %v177_v9, %v176_v10 }
  0x3e   : > { %v192_v13 = vld.sshfl [vmem:[#allocation1 + $0x10] sm:$0xff pattern:$0x75316420]  ;;  %v193_v14 = vld.sshfl [vmem:[#allocation1 + $0x18] sm:$0xff pattern:$0x75316420]  ;;  %v180_v15 = vadd.f32 %v179_v11, %v178_v12 }
  0x3f   : > { %200 = vst [vmem:[#allocation1 + $0x10] ss:$2 sm:$0xff] %v158_v1 }
  0x40   : > { %v190_v16 = vld.sshfl [vmem:[#allocation1] sm:$0xff pattern:$0x75316420]  ;;  %v191_v17 = vld.sshfl [vmem:[#allocation1 + $0x8] sm:$0xff pattern:$0x75316420]  ;;  %181 = vadd.xlane.f32.xlu0 %v180_v15 }
  0x41   : > { %198 = vst [vmem:[#allocation1] ss:$2 sm:$0xff] %v157_v2 }
  0x46   : > { %v203_v18 = vld.sshfl [vmem:[#allocation1 + $0x10] sm:$0xff pattern:$0x75316420]  ;;  %v204_v19 = vld.sshfl [vmem:[#allocation1 + $0x18] sm:$0xff pattern:$0x75316420] }
  0x47   : > { %264 = vmatpush.xpose.msra.mxu2 %v203_v18  ;;  %284 = vmatpush.xpose.msra.mxu3 %v204_v19 }
  0x48   : > { %v201_v20 = vld.sshfl [vmem:[#allocation1] sm:$0xff pattern:$0x75316420]  ;;  %v202_v21 = vld.sshfl [vmem:[#allocation1 + $0x8] sm:$0xff pattern:$0x75316420] }
  0x49   : > { %224 = vmatpush.xpose.msra.mxu0 %v201_v20  ;;  %244 = vmatpush.xpose.msra.mxu1 %v202_v21 }
  0x4a   : > { %265 = vmatmul.f32.vlgmr.msra.gmra.mxu2 %v192_v13  ;;  %285 = vmatmul.f32.vlgmr.msra.gmra.mxu3 %v193_v14 }
  0x4c   : > { %225 = vmatmul.f32.vlgmr.msra.gmra.mxu0 %v190_v16  ;;  %245 = vmatmul.f32.vlgmr.msra.gmra.mxu1 %v191_v17 }
  0xb3   : > { %v182_v23 = vpop.xlane.xlu0 %181 }
  0xb4   : > { %v183_v24 = vadd.f32 %v182_v23, %v159_v22 }
  0xb6   : > { %185 = vst.msk [vmem:[%s637_s1] sm:$0xf] %vm184_vm3, %v183_v24 }
  0xc9   : > { %v226_v25 = vpop.f32.mrf.mxu0  ;;  %v246_v26 = vpop.f32.mrf.mxu1 }
  0xca   : > { %v247_v27 = vadd.f32 %v246_v26, %v226_v25 }
  0xcd   : > { %v266_v28 = vpop.f32.mrf.mxu2  ;;  %v286_v29 = vpop.f32.mrf.mxu3 }
  0xce   : > { %v267_v30 = vadd.f32 %v266_v28, %v247_v27 }
  0xd0   : > { %v287_v32 = vadd.f32 %v286_v29, %v267_v30 }
  0xd2   : > { %v289_v33 = vadd.f32 %v287_v32, %v186_v31 }
  0xd4   : > { %291 = vst.msk [vmem:[#allocation5] sm:$0xf] %vm290_vm4, %v289_v33 }
  0xd5   : > { %374 = dma.vmem_to_hbm [thread:$0]  (%p382_p7), %s302_s26, 64, %s304_s29, [#allocation4]  }
  0xd6   : > { %497 = dma.done.wait (%p382_p7), [#allocation4], 64  }
  0xd7   : > { %499 = vsyncadd (%p382_p7), [#allocation4], 4294967232 }
  0xd8 PF: > { %p14_p8 = scmp.ge.s32.totalorder %s555_s14, 4   ;;  %s642_s9 = smov %s506_s10 }
  0xd9   : > { %s643_s10 = smov %s510_s11  ;;  %s644_s11 = smov %s565_s17 }
  0xda   : > { %s645_s12 = smov %s555_s14  ;;  %16 = sbr.rel (!%p14_p8) target bundleno = 4 (0x4), region = 76 }
  0xdf   :  { %320 = vsyncpa [#allocation3], 1 }
  0xe0   :  { %322 = vsyncpa [#allocation3 + $0x1], 1 }
  0xe1   :  { %323 = vsyncpa [#allocation4], 1 }
  0xe2   :  { %325 = vsyncpa [#allocation4 + $0x1], 1 }

</bundles_post_ra>
